<compile_context>
chip_gen: v7x
topology: tpu7x:2x2x1
jax: 0.10.0
libtpu: 0.0.40
codegen_flags: <defaults>
</compile_context>

<pallas_src>
import functools
import math

import jax
import jax.numpy as jnp
from jax.experimental import pallas as pl
from jax.experimental.pallas import tpu as pltpu


def _bilinear_seq_attn_kernel(x_ref, wy_ref, m_ref, o_ref, *, normalize):
    # x_ref:  (TB, L, H1)  f32
    # wy_ref: (TB, H1)     f32
    # m_ref:  (TB, L)      int32  (1 = padding)
    # o_ref:  (TB, L)      f32
    x = x_ref[...]                     # (TB, L, H1)
    wy = wy_ref[...]                   # (TB, H1)
    mask = m_ref[...]                  # (TB, L)

    # scores[b, l] = sum_h x[b, l, h] * wy[b, h]
    # VPU broadcast-multiply + lane reduce; keeps x in its natural
    # (sublane=L, lane=H1) layout (no XLU transpose, no M=1 MXU launch).
    scores = jnp.sum(x * wy[:, None, :], axis=-1)          # (TB, L) f32

    # masked_fill_(x_mask == 1, -inf)
    scores = jnp.where(mask == 1, -jnp.inf, scores)

    if normalize:
        # NOTE: rows that are fully masked produce NaN (0/0), matching the
        # PyTorch reference behavior.
        mx = jnp.max(scores, axis=-1, keepdims=True)
        e = jnp.exp(scores - mx)
        alpha = e / jnp.sum(e, axis=-1, keepdims=True)
    else:
        alpha = jnp.exp(scores)

    o_ref[...] = alpha.astype(o_ref.dtype)


def _choose_batch_tile(B, L, H1, *, x_bytes_budget=16 * 1024 * 1024):
    """Largest batch tile whose double-buffered x stream fits the VMEM budget."""
    per_row = 2 * L * H1 * 4          # double-buffered f32 x rows (dominant term)
    tb = max(1, x_bytes_budget // per_row)
    if tb >= B:
        return B                       # single/whole-batch tile (full-dim block ok)
    return max(8, (tb // 8) * 8)       # sublane-aligned tile


def bilinear_seq_attn(x, y, x_mask, w=None, b=None, *, normalize=True,
                      batch_tile=None):
    """x: (B, L, H1), y: (B, H2), x_mask: (B, L) (1 = pad),
    w: (H1, H2) or None (identity), b: (H1,) or None."""
    B, L, H1 = x.shape

    # --- Wy = y @ W.T + b, hoisted to a single XLA matmul (tiny: B*H1*H2) ---
    if w is not None:
        wy = jnp.dot(y, w.T, precision=jax.lax.Precision.HIGHEST)
        if b is not None:
            wy = wy + b
    else:
        wy = y                          # identity path (requires H2 == H1)
    wy = wy.astype(jnp.float32)

    mask = x_mask.astype(jnp.int32)

    # --- batch tile selection + padding so B is a multiple of TB ---
    tb = batch_tile if batch_tile is not None else _choose_batch_tile(B, L, H1)
    if tb >= B:
        tb = B
    else:
        tb = max(8, (min(tb, B) // 8) * 8)

    pad = (-B) % tb
    if pad:
        x = jnp.pad(x, ((0, pad), (0, 0), (0, 0)))
        wy = jnp.pad(wy, ((0, pad), (0, 0)))
        mask = jnp.pad(mask, ((0, pad), (0, 0)))   # pad with 0 (no -inf NaN rows)
    Bp = B + pad
    n_tiles = Bp // tb

    kernel = functools.partial(_bilinear_seq_attn_kernel, normalize=normalize)

    out = pl.pallas_call(
        kernel,
        out_shape=jax.ShapeDtypeStruct((Bp, L), jnp.float32),
        grid_spec=pltpu.PrefetchScalarGridSpec(
            num_scalar_prefetch=0,
            grid=(n_tiles,),
            in_specs=[
                pl.BlockSpec((tb, L, H1), lambda i: (i, 0, 0)),   # x tile
                pl.BlockSpec((tb, H1), lambda i: (i, 0)),          # Wy tile
                pl.BlockSpec((tb, L), lambda i: (i, 0)),           # mask tile (lane-dense)
            ],
            out_specs=pl.BlockSpec((tb, L), lambda i: (i, 0)),     # alpha tile (lane-dense)
        ),
        compiler_params=pltpu.CompilerParams(
            dimension_semantics=("parallel",),      # batch tiles split across TCs (v7x)
            vmem_limit_bytes=32 * 1024 * 1024,      # explicit; safe on v5e/v6e/v7x
        ),
    )(x, wy, mask)

    return out[:B]


def _reference(x, y, x_mask, w, b, *, normalize=True):
    wy = y @ w.T + b if w is not None else y
    scores = jnp.einsum("blh,bh->bl", x, wy,
                        precision=jax.lax.Precision.HIGHEST)
    scores = jnp.where(x_mask == 1, -jnp.inf, scores)
    if normalize:
        return jax.nn.softmax(scores, axis=-1)
    return jnp.exp(scores)


if __name__ == "__main__":
    # --- small primary test (matches module docstring shapes) ---
    B, L, H1, H2 = 2, 8, 32, 16      # batch, seq len, x_size, y_size

    key = jax.random.PRNGKey(0)
    kx, ky, kw, kb = jax.random.split(key, 4)

    x = jax.random.normal(kx, (B, L, H1), dtype=jnp.float32)
    y = jax.random.normal(ky, (B, H2), dtype=jnp.float32)

    # nn.Linear(y_size, x_size) init: uniform(-1/sqrt(y_size), 1/sqrt(y_size))
    bound = 1.0 / math.sqrt(H2)
    w = jax.random.uniform(kw, (H1, H2), jnp.float32, -bound, bound)
    b = jax.random.uniform(kb, (H1,), jnp.float32, -bound, bound)

    # Padding mask: 1 = pad, 0 = real token (batch 0 full length, batch 1 len=5)
    lens = jnp.array([8, 5])
    x_mask = (jnp.arange(L)[None, :] >= lens[:, None]).astype(jnp.int32)

    alpha = jax.block_until_ready(bilinear_seq_attn(x, y, x_mask, w, b,
                                                    normalize=True))
    ref = _reference(x, y, x_mask, w, b, normalize=True)
    assert alpha.shape == (B, L)
    assert jnp.allclose(alpha, ref, rtol=1e-5, atol=1e-5), (alpha, ref)

    # normalize=False path
    alpha_e = jax.block_until_ready(bilinear_seq_attn(x, y, x_mask, w, b,
                                                      normalize=False))
    ref_e = _reference(x, y, x_mask, w, b, normalize=False)
    assert jnp.allclose(alpha_e, ref_e, rtol=1e-5, atol=1e-5), (alpha_e, ref_e)

    # --- medium test: multiple batch tiles + batch padding (B=20, TB=8 -> 3 tiles) ---
    B2, L2 = 20, 16
    kx2, ky2, km2 = jax.random.split(jax.random.PRNGKey(1), 3)
    x2 = jax.random.normal(kx2, (B2, L2, H1), dtype=jnp.float32)
    y2 = jax.random.normal(ky2, (B2, H2), dtype=jnp.float32)
    lens2 = jax.random.randint(km2, (B2,), 1, L2 + 1)
    mask2 = (jnp.arange(L2)[None, :] >= lens2[:, None]).astype(jnp.int32)

    alpha2 = jax.block_until_ready(
        bilinear_seq_attn(x2, y2, mask2, w, b, normalize=True, batch_tile=8))
    ref2 = _reference(x2, y2, mask2, w, b, normalize=True)
    assert alpha2.shape == (B2, L2)
    assert jnp.allclose(alpha2, ref2, rtol=1e-5, atol=1e-5), (alpha2, ref2)

    print("KERNEL_OK")
</pallas_src>

<mosaic_0001>
module attributes {stable_mosaic.version = 11 : i64} {
  func.func @_bilinear_seq_attn_kernel(%arg0: i32, %arg1: memref<2x8x32xf32, #tpu.memory_space<vmem>>, %arg2: memref<2x32xf32, #tpu.memory_space<vmem>>, %arg3: memref<2x8xi32, #tpu.memory_space<vmem>>, %arg4: memref<2x8xf32, #tpu.memory_space<vmem>>) attributes {dimension_semantics = [#tpu.dimension_semantics<parallel>], iteration_bounds = array<i64: 1>, scalar_prefetch = 0 : i64, scratch_operands = 0 : i64, tpu.core_type = #tpu.core_type<tc>, window_params = [{transform_indices = @transform_0, window_bounds = array<i64: 2, 8, 32>}, {transform_indices = @transform_1, window_bounds = array<i64: 2, 32>}, {transform_indices = @transform_2, window_bounds = array<i64: 2, 8>}, {transform_indices = @transform_3, window_bounds = array<i64: 2, 8>}]} {
    %c0 = arith.constant 0 : index
    %c0_0 = arith.constant 0 : index
    %c0_1 = arith.constant 0 : index
    %0 = vector.load %arg1[%c0, %c0_0, %c0_1] : memref<2x8x32xf32, #tpu.memory_space<vmem>>, vector<2x8x32xf32>
    %c0_2 = arith.constant 0 : index
    %c0_3 = arith.constant 0 : index
    %1 = vector.load %arg2[%c0_2, %c0_3] : memref<2x32xf32, #tpu.memory_space<vmem>>, vector<2x32xf32>
    %c0_4 = arith.constant 0 : index
    %c0_5 = arith.constant 0 : index
    %2 = vector.load %arg3[%c0_4, %c0_5] : memref<2x8xi32, #tpu.memory_space<vmem>>, vector<2x8xi32>
    %3 = vector.shape_cast %1 : vector<2x32xf32> to vector<2x1x32xf32>
    %4 = vector.broadcast %3 : vector<2x1x32xf32> to vector<2x8x32xf32>
    %5 = arith.mulf %0, %4 : vector<2x8x32xf32>
    %cst = arith.constant dense<0.000000e+00> : vector<2x8xf32>
    %6 = vector.multi_reduction <add>, %5, %cst [2] : vector<2x8x32xf32> to vector<2x8xf32>
    %c1_i32 = arith.constant 1 : i32
    %7 = vector.broadcast %c1_i32 : i32 to vector<2x8xi32>
    %8 = arith.cmpi eq, %2, %7 : vector<2x8xi32>
    %cst_6 = arith.constant 0xFF800000 : f32
    %9 = vector.broadcast %cst_6 : f32 to vector<2x8xf32>
    %10 = arith.select %8, %9, %6 : vector<2x8xi1>, vector<2x8xf32>
    %cst_7 = arith.constant dense<0xFF800000> : vector<2xf32>
    %11 = vector.multi_reduction <maximumf>, %10, %cst_7 [1] : vector<2x8xf32> to vector<2xf32>
    %12 = vector.shape_cast %11 : vector<2xf32> to vector<2x1xf32>
    %13 = vector.broadcast %12 : vector<2x1xf32> to vector<2x8xf32>
    %14 = arith.subf %10, %13 : vector<2x8xf32>
    %15 = math.exp %14 : vector<2x8xf32>
    %cst_8 = arith.constant dense<0.000000e+00> : vector<2xf32>
    %16 = vector.multi_reduction <add>, %15, %cst_8 [1] : vector<2x8xf32> to vector<2xf32>
    %17 = vector.shape_cast %16 : vector<2xf32> to vector<2x1xf32>
    %18 = vector.broadcast %17 : vector<2x1xf32> to vector<2x8xf32>
    %19 = arith.divf %15, %18 : vector<2x8xf32>
    %c0_9 = arith.constant 0 : index
    %c0_10 = arith.constant 0 : index
    %20 = vector.load %arg4[%c0_9, %c0_10] : memref<2x8xf32, #tpu.memory_space<vmem>>, vector<2x8xf32>
    tpu.vector_store %arg4[%c0_9, %c0_10], %19 {strides = array<i32>} : memref<2x8xf32, #tpu.memory_space<vmem>>, vector<2x8xf32>,
    return
  }
  func.func @transform_0(%arg0: i32) -> (i32, i32, i32) {
    %c0_i32 = arith.constant 0 : i32
    %c0_i32_0 = arith.constant 0 : i32
    %c0_i32_1 = arith.constant 0 : i32
    return %arg0, %c0_i32, %c0_i32_0 : i32, i32, i32
  }
  func.func @transform_1(%arg0: i32) -> (i32, i32) {
    %c0_i32 = arith.constant 0 : i32
    %c0_i32_0 = arith.constant 0 : i32
    return %arg0, %c0_i32 : i32, i32
  }
  func.func @transform_2(%arg0: i32) -> (i32, i32) {
    %c0_i32 = arith.constant 0 : i32
    %c0_i32_0 = arith.constant 0 : i32
    return %arg0, %c0_i32 : i32, i32
  }
  func.func @transform_3(%arg0: i32) -> (i32, i32) {
    %c0_i32 = arith.constant 0 : i32
    %c0_i32_0 = arith.constant 0 : i32
    return %arg0, %c0_i32 : i32, i32
  }
}

</mosaic_0001>

<bundles_post_ra>
// kernel: tpu_custom_call.1
= control target key start
LH: loop header
LB: loop body
LE: loop exit
PB: predicated region body
PF: predicated region fallthrough
CT: control target
= control target key end

     0   :  { %8 = vsyncpa [#allocation3], 0  ;;  %s236_s0 = inlined_call_operand.hbm [shape: f32[2,8,32], index: 0, kind: input, shape index: {}]   ;;  %s237_s1 = inlined_call_operand.vmem [shape: f32[2,32], index: 1, kind: input, shape index: {}]   ;;  %s238_s2 = inlined_call_operand.vmem [shape: s32[2,8], index: 2, kind: input, shape index: {}]   ;;  %s239_s3 = inlined_call_operand.hbm [shape: f32[2,8], index: 3, kind: output, shape index: {}]  }
   0x1   :  { %9 = vsyncpa [#allocation4], 0  ;;  %s178_s12 = smov [#allocation2]   ;;  %s130_s16 = scalar_lea.hbm %s236_s0, 256 }
   0x2   :  { %s15_s13 = sshll.u32 %s178_s12, 4  ;;  %p131_p0 = scmp.ne.s32.totalorder %s236_s0, %s130_s16  ;;  %s16_s13 = int_to_ptr.vmem [resolvable:$true] %s15_s13 }
   0x3   :  { %p134_p1 = scmp.lt.u32.totalorder %s130_s16, %s236_s0 }
   0x5   :  { %p136_p2 = pnand %p134_p1, %p131_p0 }
   0x7   :  { %139 = shalt.err (!%p136_p2)
}
   0x8   :  { %s140_s21 = scalar_lea.vmem %s16_s13, 256  ;;  %p145_p4 = scmp.lt.s32.totalorder %s16_s13, %s16_s13 }
   0x9   :  { %p141_p3 = scmp.ne.s32.totalorder %s16_s13, %s140_s21  ;;  %p146_p5 = scmp.lt.s32.totalorder %s140_s21, %s140_s21 }
   0xb   :  { %p147_p6 = por %p146_p5, %p145_p4 }
   0xd   :  { %p148_p7 = pnand %p147_p6, %p141_p3 }
   0xf   :  { %151 = shalt.err (!%p148_p7)
}
  0x10   :  { %s179_s22 = smov 128   ;;  %s180_s23 = smov 8  }
  0x11   :  { %21 = dma.hbm_to_vmem [thread:$0]  %s236_s0, 256, %s16_s13, [#allocation3], %s179_s22, %s179_s22, %s180_s23  }
  0x12   :  { %174 = dma.done.wait [#allocation3], 256  }
  0x13   :  { %175 = vsyncadd [#allocation3], 4294967040  ;;  %v45_v0 = vlaneseq  ;;  %v181_v1 = vmov 1966171168   ;;  %v29_v12 = vld [vmem:[#allocation2] sm:$0xff]  ;;  %vm68_vm0 = vcmask 261120  }
  0x14   :  { %v43_v2 = vunpack.c.l.s4 %v181_v1  ;;  %v120_v9 = vld.sshfl [vmem:[%s237_s1] sm:$0x11 pattern:$0x75316420]  ;;  %v30_v15 = vld [vmem:[#allocation2 + $0x8] sm:$0xff]  ;;  %vm88_vm1 = vcmask 1041409  }
  0x15   :  { %v46_v3 = vshrl.u32 %v45_v0, 7  ;;  %v79_v4 = vand.u32 127, %v45_v0  ;;  %v41_v10 = vcombine.high %v120_v9, %v120_v9  ;;  %v32_v22 = vld [vmem:[%s238_s2] sm:$0x3]  ;;  %vm92_vm3 = vcmask 58368   ;;  %s182_s1 = smov [#allocation5]  }
  0x16   :  { %v44_v5 = vunpack.c.0.s8 %v43_v2  ;;  %vm75_vm2 = vcmp.eq.s32.totalorder %v32_v22, 1  ;;  %s111_s2 = sshll.u32 %s182_s1, 4  ;;  %s112_s2 = int_to_ptr.vmem [resolvable:$true] %s111_s2 }
  0x17   :  { %v82_v6 = vsub.s32 %v79_v4, %v46_v3  ;;  %v58_v8 = vsub.s32 0, %v46_v3  ;;  %s152_s29 = scalar_lea.vmem %s112_s2, 32  ;;  %p157_p9 = scmp.lt.s32.totalorder %s112_s2, %s112_s2 }
  0x18   :  { %v47_v7 = vsub.s32 %v44_v5, %v46_v3  ;;  %p153_p8 = scmp.ne.s32.totalorder %s112_s2, %s152_s29  ;;  %p158_p10 = scmp.lt.s32.totalorder %s152_s29, %s152_s29 }
  0x1a   :  { %v48_v11 = vrot.slane %v120_v9, %v47_v7  ;;  %v55_v14 = vrot.slane %v41_v10, %v47_v7  ;;  %p159_p11 = por %p158_p10, %p157_p9 }
  0x1c   :  { %v59_v13 = vrot.slane %v48_v11, %v58_v8  ;;  %v63_v17 = vrot.slane %v55_v14, %v58_v8  ;;  %p160_p12 = pnand %p159_p11, %p153_p8 }
  0x1e   :  { %v66_v16 = vmul.f32 %v59_v13, %v29_v12  ;;  %v67_v19 = vmul.f32 %v63_v17, %v30_v15 }
  0x20   :  { %v69_v18 = vsel %vm68_vm0, %v66_v16, 0.0  ;;  %v72_v20 = vsel %vm68_vm0, %v67_v19, 0.0 }
  0x21   :  { %70 = vadd.xlane.f32.xlu0 %v69_v18 }
  0x25   :  { %73 = vadd.xlane.f32.xlu0 %v72_v20 }
  0xae   :  { %v71_v21 = vpop.xlane.xlu0 %70 }
  0xaf   :  { %v83_v24 = vrot.slane %v71_v21, %v82_v6 }
  0xb2   :  { %v74_v23 = vpop.xlane.xlu0 %73 }
  0xb3   :  { %v87_v25 = vrot.slane %v74_v23, %v82_v6 }
  0xb5   :  { %v89_v26 = vsel %vm88_vm1, %v87_v25, %v83_v24 }
  0xb6   :  { %v91_v27 = vsel %vm75_vm2, -inf, %v89_v26 }
  0xb7   :  { %v93_v28 = vsel %vm92_vm3, %v91_v27, -inf }
  0xb8   :  { %94 = vmax.xlane.f32.xlu1 %v93_v28 }
 0x145   :  { %v95_v29 = vpop.xlane.xlu1 %94 }
 0x146   :  { %v96_v30 = vsub.f32 %v91_v27, %v95_v29 }
 0x148   :  { %v97_v31 = vmul.f32 1.442695, %v96_v30 }
 0x14a   :  { %126 = vpow2.f32 %v97_v31 }
 0x154   :  { %v127_v32 = vpop.eup %126 }
 0x155   :  { %v99_v33 = vsel %vm92_vm3, %v127_v32, 0.0 }
 0x156   :  { %100 = vadd.xlane.f32.xlu1 %v99_v33 }
 0x1e3   :  { %v101_v34 = vpop.xlane.xlu1 %100 }
 0x1e4   :  { %128 = vrcp.f32 %v101_v34 }
 0x1ee   :  { %v129_v35 = vpop.eup %128 }
 0x1ef   :  { %v103_v36 = vmul.f32 %v129_v35, %v127_v32 }
 0x1f1   :  { %104 = vst.msk [vmem:[#allocation5] sm:$0x3] %vm92_vm3, %v103_v36 }
 0x1f2   :  { %163 = shalt.err (!%p160_p12)
}
 0x1f3   :  { %s164_s5 = scalar_lea.hbm %s239_s3, 32 }
 0x1f4   :  { %p165_p13 = scmp.ne.s32.totalorder %s239_s3, %s164_s5  ;;  %p168_p0 = scmp.lt.u32.totalorder %s164_s5, %s239_s3 }
 0x1f6   :  { %p170_p1 = pnand %p168_p0, %p165_p13 }
 0x1f8   :  { %173 = shalt.err (!%p170_p1)
}
 0x1f9   :  { %114 = dma.vmem_to_hbm [thread:$0]  %s112_s2, 32, %s239_s3, [#allocation4]  }
 0x1fa   :  { %176 = dma.done.wait [#allocation4], 32  }
 0x1fb   :  { %177 = vsyncadd [#allocation4], 4294967264 }
 0x1fc   :  { %118 = vsyncpa [#allocation3], 1 }
 0x1fd   :  { %119 = vsyncpa [#allocation4], 1 }

</bundles_post_ra>
